<compile_context>
chip_gen: v6e
topology: v6e:2x2x1
jax: 0.10.0
libtpu: 0.0.40
codegen_flags: <defaults>
</compile_context>

<pallas_src>
import jax
import jax.numpy as jnp
from jax.experimental import pallas as pl
from jax.experimental.pallas import tpu as pltpu

LANE = 128      # last-dim padding target (lane width)
SUBLANE = 8     # batch-tile alignment (sublane width)


def _round_up(n, m):
    return ((n + m - 1) // m) * m


def _pad2(a, rows, cols):
    """Zero-pad a 2-D array up to (rows, cols)."""
    r, c = a.shape
    if r == rows and c == cols:
        return a
    return jnp.pad(a, ((0, rows - r), (0, cols - c)))


def mlp_kernel(x_ref, w1_ref, b1_ref, w2_ref, b2_ref, w3_ref, b3_ref, o_ref):
    # Layer 1: bf16 x @ bf16 W -> f32 accumulate on MXU; bias + ReLU in f32 (VPU).
    h = jnp.dot(x_ref[...], w1_ref[...], preferred_element_type=jnp.float32)
    h = jnp.maximum(h + b1_ref[...], 0.0)
    # Layer 2
    h = jnp.dot(h.astype(w2_ref.dtype), w2_ref[...],
                preferred_element_type=jnp.float32)
    h = jnp.maximum(h + b2_ref[...], 0.0)
    # Layer 3
    h = jnp.dot(h.astype(w3_ref.dtype), w3_ref[...],
                preferred_element_type=jnp.float32)
    h = jnp.maximum(h + b3_ref[...], 0.0)
    o_ref[...] = h.astype(o_ref.dtype)


def neural_net_forward(x, params, *, batch_tile=None, matmul_dtype=jnp.bfloat16):
    """x: (B, insize) float32. params: dict with w1,b1,w2,b2,w3,b3 (W as (in,out))."""
    B, insize = x.shape
    hsize = params["w1"].shape[1]
    nclasses = params["w3"].shape[1]

    # ---- padded (lane-dense) sizes -------------------------------------------
    Ip = _round_up(insize, LANE)
    Hp = _round_up(hsize, LANE)
    Np = _round_up(nclasses, LANE)

    # ---- batch tile: multiple of 8, real grid when B is large ----------------
    if batch_tile is None:
        tb = min(_round_up(B, SUBLANE), 256)
    else:
        assert batch_tile > 0
        tb = batch_tile
    tb = _round_up(tb, SUBLANE)
    Bp = _round_up(B, tb)
    assert tb % SUBLANE == 0 and Bp % tb == 0

    # ---- pad + cast inputs (zero padding keeps the math exact) ---------------
    xp = _pad2(x, Bp, Ip).astype(matmul_dtype)
    w1p = _pad2(params["w1"], Ip, Hp).astype(matmul_dtype)
    w2p = _pad2(params["w2"], Hp, Hp).astype(matmul_dtype)
    w3p = _pad2(params["w3"], Hp, Np).astype(matmul_dtype)
    b1p = _pad2(params["b1"], 1, Hp).astype(jnp.float32)
    b2p = _pad2(params["b2"], 1, Hp).astype(jnp.float32)
    b3p = _pad2(params["b3"], 1, Np).astype(jnp.float32)

    # ---- VMEM budget + cost estimate ------------------------------------------
    weight_bytes = sum(int(a.size) * a.dtype.itemsize
                       for a in (w1p, b1p, w2p, b2p, w3p, b3p))
    act_bytes = tb * (Ip * xp.dtype.itemsize + Np * 4 + 2 * Hp * 4)
    vmem_limit = int(min(max(2 * weight_bytes + 4 * act_bytes + (4 << 20),
                             32 << 20), 64 << 20))   # <= v7x physical 64 MiB

    flops = 2 * Bp * (Ip * Hp + Hp * Hp + Hp * Np)
    bytes_accessed = int(xp.size) * xp.dtype.itemsize + weight_bytes + Bp * Np * 4
    cost = pl.CostEstimate(flops=flops, transcendentals=0,
                           bytes_accessed=bytes_accessed)

    # ---- specs ----------------------------------------------------------------
    def const_spec(shape, single_buffer):
        # Grid-invariant block (weights/biases): stays resident; optionally
        # single-buffered to halve resident weight VMEM on v7x.
        if single_buffer:
            return pl.BlockSpec(shape, lambda i: (0, 0),
                                pipeline_mode=pl.Buffered(1))
        return pl.BlockSpec(shape, lambda i: (0, 0))

    def build(single_buffer_weights):
        in_specs = [
            pl.BlockSpec((tb, Ip), lambda i: (i, 0)),            # x tile (pipelined)
            const_spec((Ip, Hp), single_buffer_weights),         # w1
            const_spec((1, Hp), single_buffer_weights),          # b1
            const_spec((Hp, Hp), single_buffer_weights),         # w2
            const_spec((1, Hp), single_buffer_weights),          # b2
            const_spec((Hp, Np), single_buffer_weights),         # w3
            const_spec((1, Np), single_buffer_weights),          # b3
        ]
        return pl.pallas_call(
            mlp_kernel,
            out_shape=jax.ShapeDtypeStruct((Bp, Np), jnp.float32),
            grid_spec=pltpu.PrefetchScalarGridSpec(
                num_scalar_prefetch=0,
                grid=(Bp // tb,),
                in_specs=in_specs,
                out_specs=pl.BlockSpec((tb, Np), lambda i: (i, 0)),
            ),
            compiler_params=pltpu.CompilerParams(
                dimension_semantics=("parallel",),
                vmem_limit_bytes=vmem_limit,
            ),
            cost_estimate=cost,
        )

    args = (xp, w1p, b1p, w2p, b2p, w3p, b3p)
    try:
        out_p = build(True)(*args)
    except Exception:
        # pl.Buffered(1) not supported by this jax/libtpu -> default buffering.
        out_p = build(False)(*args)

    # Slice padding back off (padded rows/cols are exact zeros after ReLU).
    return out_p[:B, :nclasses]


def init_params(key, insize, hsize, nclasses):
    """nn.Linear-style init; weights stored transposed as (in, out) so the
    kernel computes y = x @ W + b."""
    ks = jax.random.split(key, 6)

    def linear(kw, kb, fan_in, fan_out):
        bound = 1.0 / jnp.sqrt(fan_in)
        w = jax.random.uniform(kw, (fan_in, fan_out), jnp.float32, -bound, bound)
        b = jax.random.uniform(kb, (1, fan_out), jnp.float32, -bound, bound)
        return w, b

    w1, b1 = linear(ks[0], ks[1], insize, hsize)
    w2, b2 = linear(ks[2], ks[3], hsize, hsize)
    w3, b3 = linear(ks[4], ks[5], hsize, nclasses)
    return dict(w1=w1, b1=b1, w2=w2, b2=b2, w3=w3, b3=b3)


def reference_forward(x, p, matmul_dtype=jnp.float32):
    def lin(h, w, b):
        h = jnp.dot(h.astype(matmul_dtype), w.astype(matmul_dtype),
                    preferred_element_type=jnp.float32)
        return jnp.maximum(h + b, 0.0)

    h = lin(x, p["w1"], p["b1"])
    h = lin(h, p["w2"], p["b2"])
    return lin(h, p["w3"], p["b3"])


if __name__ == "__main__":
    key = jax.random.PRNGKey(0)
    k_x, k_p = jax.random.split(key)

    # Small, deliberately non-aligned shapes to exercise padding + multi-step grid.
    B, insize, hsize, nclasses = 20, 20, 64, 10
    x = jax.random.normal(k_x, (B, insize), jnp.float32)
    params = init_params(k_p, insize, hsize, nclasses)

    out = neural_net_forward(x, params, batch_tile=8)   # grid = (3,)
    out = jax.block_until_ready(out)
    assert out.shape == (B, nclasses)

    # Reference on the same numerical path (bf16 matmul inputs, f32 accumulate).
    ref_bf16 = reference_forward(x, params, jnp.bfloat16)
    assert jnp.allclose(out, ref_bf16, atol=1e-3, rtol=1e-3), \
        float(jnp.max(jnp.abs(out - ref_bf16)))

    # Sanity vs the pure-f32 PyTorch semantics (loose tol for bf16 matmul inputs).
    ref_f32 = reference_forward(x, params, jnp.float32)
    assert jnp.allclose(out, ref_f32, atol=5e-2, rtol=5e-2)

    print("KERNEL_OK")
</pallas_src>

<mosaic_0001>
module attributes {stable_mosaic.version = 11 : i64} {
  func.func @mlp_kernel(%arg0: i32, %arg1: memref<8x128xbf16, #tpu.memory_space<vmem>>, %arg2: memref<128x128xbf16, #tpu.memory_space<vmem>>, %arg3: memref<1x128xf32, #tpu.memory_space<vmem>>, %arg4: memref<128x128xbf16, #tpu.memory_space<vmem>>, %arg5: memref<1x128xf32, #tpu.memory_space<vmem>>, %arg6: memref<128x128xbf16, #tpu.memory_space<vmem>>, %arg7: memref<1x128xf32, #tpu.memory_space<vmem>>, %arg8: memref<8x128xf32, #tpu.memory_space<vmem>>) attributes {dimension_semantics = [#tpu.dimension_semantics<parallel>], iteration_bounds = array<i64: 3>, scalar_prefetch = 0 : i64, scratch_operands = 0 : i64, tpu.core_type = #tpu.core_type<tc>, window_params = [{transform_indices = @transform_0, window_bounds = array<i64: 8, 128>}, {pipeline_mode = #tpu.pipeline_mode<synchronous>, transform_indices = @transform_1, window_bounds = array<i64: 128, 128>}, {pipeline_mode = #tpu.pipeline_mode<synchronous>, transform_indices = @transform_2, window_bounds = array<i64: 1, 128>}, {pipeline_mode = #tpu.pipeline_mode<synchronous>, transform_indices = @transform_3, window_bounds = array<i64: 128, 128>}, {pipeline_mode = #tpu.pipeline_mode<synchronous>, transform_indices = @transform_4, window_bounds = array<i64: 1, 128>}, {pipeline_mode = #tpu.pipeline_mode<synchronous>, transform_indices = @transform_5, window_bounds = array<i64: 128, 128>}, {pipeline_mode = #tpu.pipeline_mode<synchronous>, transform_indices = @transform_6, window_bounds = array<i64: 1, 128>}, {transform_indices = @transform_7, window_bounds = array<i64: 8, 128>}]} {
    %c0 = arith.constant 0 : index
    %c0_0 = arith.constant 0 : index
    %0 = vector.load %arg1[%c0, %c0_0] : memref<8x128xbf16, #tpu.memory_space<vmem>>, vector<8x128xbf16>
    %c0_1 = arith.constant 0 : index
    %c0_2 = arith.constant 0 : index
    %1 = vector.load %arg2[%c0_1, %c0_2] : memref<128x128xbf16, #tpu.memory_space<vmem>>, vector<128x128xbf16>
    %cst = arith.constant dense<0.000000e+00> : vector<8x128xf32>
    %2 = tpu.matmul %0, %1, %cst {dimension_numbers = #tpu.dot_dimension_numbers<[1], [0], [0], [1], [0, 0, 1, 1], [], []>} : vector<8x128xbf16>, vector<128x128xbf16>, vector<8x128xf32> -> vector<8x128xf32>
    %c0_3 = arith.constant 0 : index
    %c0_4 = arith.constant 0 : index
    %3 = vector.load %arg3[%c0_3, %c0_4] : memref<1x128xf32, #tpu.memory_space<vmem>>, vector<1x128xf32>
    %4 = vector.broadcast %3 : vector<1x128xf32> to vector<8x128xf32>
    %5 = arith.addf %2, %4 : vector<8x128xf32>
    %cst_5 = arith.constant 0.000000e+00 : f32
    %6 = vector.broadcast %cst_5 : f32 to vector<8x128xf32>
    %7 = arith.maximumf %5, %6 : vector<8x128xf32>
    %8 = arith.truncf %7 : vector<8x128xf32> to vector<8x128xbf16>
    %c0_6 = arith.constant 0 : index
    %c0_7 = arith.constant 0 : index
    %9 = vector.load %arg4[%c0_6, %c0_7] : memref<128x128xbf16, #tpu.memory_space<vmem>>, vector<128x128xbf16>
    %cst_8 = arith.constant dense<0.000000e+00> : vector<8x128xf32>
    %10 = tpu.matmul %8, %9, %cst_8 {dimension_numbers = #tpu.dot_dimension_numbers<[1], [0], [0], [1], [0, 0, 1, 1], [], []>} : vector<8x128xbf16>, vector<128x128xbf16>, vector<8x128xf32> -> vector<8x128xf32>
    %c0_9 = arith.constant 0 : index
    %c0_10 = arith.constant 0 : index
    %11 = vector.load %arg5[%c0_9, %c0_10] : memref<1x128xf32, #tpu.memory_space<vmem>>, vector<1x128xf32>
    %12 = vector.broadcast %11 : vector<1x128xf32> to vector<8x128xf32>
    %13 = arith.addf %10, %12 : vector<8x128xf32>
    %cst_11 = arith.constant 0.000000e+00 : f32
    %14 = vector.broadcast %cst_11 : f32 to vector<8x128xf32>
    %15 = arith.maximumf %13, %14 : vector<8x128xf32>
    %16 = arith.truncf %15 : vector<8x128xf32> to vector<8x128xbf16>
    %c0_12 = arith.constant 0 : index
    %c0_13 = arith.constant 0 : index
    %17 = vector.load %arg6[%c0_12, %c0_13] : memref<128x128xbf16, #tpu.memory_space<vmem>>, vector<128x128xbf16>
    %cst_14 = arith.constant dense<0.000000e+00> : vector<8x128xf32>
    %18 = tpu.matmul %16, %17, %cst_14 {dimension_numbers = #tpu.dot_dimension_numbers<[1], [0], [0], [1], [0, 0, 1, 1], [], []>} : vector<8x128xbf16>, vector<128x128xbf16>, vector<8x128xf32> -> vector<8x128xf32>
    %c0_15 = arith.constant 0 : index
    %c0_16 = arith.constant 0 : index
    %19 = vector.load %arg7[%c0_15, %c0_16] : memref<1x128xf32, #tpu.memory_space<vmem>>, vector<1x128xf32>
    %20 = vector.broadcast %19 : vector<1x128xf32> to vector<8x128xf32>
    %21 = arith.addf %18, %20 : vector<8x128xf32>
    %cst_17 = arith.constant 0.000000e+00 : f32
    %22 = vector.broadcast %cst_17 : f32 to vector<8x128xf32>
    %23 = arith.maximumf %21, %22 : vector<8x128xf32>
    %c0_18 = arith.constant 0 : index
    %c0_19 = arith.constant 0 : index
    %24 = vector.load %arg8[%c0_18, %c0_19] : memref<8x128xf32, #tpu.memory_space<vmem>>, vector<8x128xf32>
    tpu.vector_store %arg8[%c0_18, %c0_19], %23 {strides = array<i32>} : memref<8x128xf32, #tpu.memory_space<vmem>>, vector<8x128xf32>,
    return
  }
  func.func @transform_0(%arg0: i32) -> (i32, i32) {
    %c0_i32 = arith.constant 0 : i32
    %c0_i32_0 = arith.constant 0 : i32
    return %arg0, %c0_i32 : i32, i32
  }
  func.func @transform_1(%arg0: i32) -> (i32, i32) {
    %c0_i32 = arith.constant 0 : i32
    %c0_i32_0 = arith.constant 0 : i32
    %c0_i32_1 = arith.constant 0 : i32
    return %c0_i32, %c0_i32_0 : i32, i32
  }
  func.func @transform_2(%arg0: i32) -> (i32, i32) {
    %c0_i32 = arith.constant 0 : i32
    %c0_i32_0 = arith.constant 0 : i32
    %c0_i32_1 = arith.constant 0 : i32
    return %c0_i32, %c0_i32_0 : i32, i32
  }
  func.func @transform_3(%arg0: i32) -> (i32, i32) {
    %c0_i32 = arith.constant 0 : i32
    %c0_i32_0 = arith.constant 0 : i32
    %c0_i32_1 = arith.constant 0 : i32
    return %c0_i32, %c0_i32_0 : i32, i32
  }
  func.func @transform_4(%arg0: i32) -> (i32, i32) {
    %c0_i32 = arith.constant 0 : i32
    %c0_i32_0 = arith.constant 0 : i32
    %c0_i32_1 = arith.constant 0 : i32
    return %c0_i32, %c0_i32_0 : i32, i32
  }
  func.func @transform_5(%arg0: i32) -> (i32, i32) {
    %c0_i32 = arith.constant 0 : i32
    %c0_i32_0 = arith.constant 0 : i32
    %c0_i32_1 = arith.constant 0 : i32
    return %c0_i32, %c0_i32_0 : i32, i32
  }
  func.func @transform_6(%arg0: i32) -> (i32, i32) {
    %c0_i32 = arith.constant 0 : i32
    %c0_i32_0 = arith.constant 0 : i32
    %c0_i32_1 = arith.constant 0 : i32
    return %c0_i32, %c0_i32_0 : i32, i32
  }
  func.func @transform_7(%arg0: i32) -> (i32, i32) {
    %c0_i32 = arith.constant 0 : i32
    %c0_i32_0 = arith.constant 0 : i32
    return %arg0, %c0_i32 : i32, i32
  }
}

module attributes {stable_mosaic.version = 11 : i64} {
  func.func @mlp_kernel(%arg0: i32, %arg1: memref<8x128xbf16, #tpu.memory_space<vmem>>, %arg2: memref<128x128xbf16, #tpu.memory_space<vmem>>, %arg3: memref<1x128xf32, #tpu.memory_space<vmem>>, %arg4: memref<128x128xbf16, #tpu.memory_space<vmem>>, %arg5: memref<1x128xf32, #tpu.memory_space<vmem>>, %arg6: memref<128x128xbf16, #tpu.memory_space<vmem>>, %arg7: memref<1x128xf32, #tpu.memory_space<vmem>>, %arg8: memref<8x128xf32, #tpu.memory_space<vmem>>) attributes {dimension_semantics = [#tpu.dimension_semantics<parallel>], iteration_bounds = array<i64: 3>, scalar_prefetch = 0 : i64, scratch_operands = 0 : i64, tpu.core_type = #tpu.core_type<tc>, window_params = [{transform_indices = @transform_0, window_bounds = array<i64: 8, 128>}, {pipeline_mode = #tpu.pipeline_mode<synchronous>, transform_indices = @transform_1, window_bounds = array<i64: 128, 128>}, {pipeline_mode = #tpu.pipeline_mode<synchronous>, transform_indices = @transform_2, window_bounds = array<i64: 1, 128>}, {pipeline_mode = #tpu.pipeline_mode<synchronous>, transform_indices = @transform_3, window_bounds = array<i64: 128, 128>}, {pipeline_mode = #tpu.pipeline_mode<synchronous>, transform_indices = @transform_4, window_bounds = array<i64: 1, 128>}, {pipeline_mode = #tpu.pipeline_mode<synchronous>, transform_indices = @transform_5, window_bounds = array<i64: 128, 128>}, {pipeline_mode = #tpu.pipeline_mode<synchronous>, transform_indices = @transform_6, window_bounds = array<i64: 1, 128>}, {transform_indices = @transform_7, window_bounds = array<i64: 8, 128>}]} {
    %c0 = arith.constant 0 : index
    %c0_0 = arith.constant 0 : index
    %0 = vector.load %arg1[%c0, %c0_0] : memref<8x128xbf16, #tpu.memory_space<vmem>>, vector<8x128xbf16>
    %c0_1 = arith.constant 0 : index
    %c0_2 = arith.constant 0 : index
    %1 = vector.load %arg2[%c0_1, %c0_2] : memref<128x128xbf16, #tpu.memory_space<vmem>>, vector<128x128xbf16>
    %cst = arith.constant dense<0.000000e+00> : vector<8x128xf32>
    %2 = tpu.matmul %0, %1, %cst {dimension_numbers = #tpu.dot_dimension_numbers<[1], [0], [0], [1], [0, 0, 1, 1], [], []>} : vector<8x128xbf16>, vector<128x128xbf16>, vector<8x128xf32> -> vector<8x128xf32>
    %c0_3 = arith.constant 0 : index
    %c0_4 = arith.constant 0 : index
    %3 = vector.load %arg3[%c0_3, %c0_4] : memref<1x128xf32, #tpu.memory_space<vmem>>, vector<1x128xf32>
    %4 = vector.broadcast %3 : vector<1x128xf32> to vector<8x128xf32>
    %5 = arith.addf %2, %4 : vector<8x128xf32>
    %cst_5 = arith.constant 0.000000e+00 : f32
    %6 = vector.broadcast %cst_5 : f32 to vector<8x128xf32>
    %7 = arith.maximumf %5, %6 : vector<8x128xf32>
    %8 = arith.truncf %7 : vector<8x128xf32> to vector<8x128xbf16>
    %c0_6 = arith.constant 0 : index
    %c0_7 = arith.constant 0 : index
    %9 = vector.load %arg4[%c0_6, %c0_7] : memref<128x128xbf16, #tpu.memory_space<vmem>>, vector<128x128xbf16>
    %cst_8 = arith.constant dense<0.000000e+00> : vector<8x128xf32>
    %10 = tpu.matmul %8, %9, %cst_8 {dimension_numbers = #tpu.dot_dimension_numbers<[1], [0], [0], [1], [0, 0, 1, 1], [], []>} : vector<8x128xbf16>, vector<128x128xbf16>, vector<8x128xf32> -> vector<8x128xf32>
    %c0_9 = arith.constant 0 : index
    %c0_10 = arith.constant 0 : index
    %11 = vector.load %arg5[%c0_9, %c0_10] : memref<1x128xf32, #tpu.memory_space<vmem>>, vector<1x128xf32>
    %12 = vector.broadcast %11 : vector<1x128xf32> to vector<8x128xf32>
    %13 = arith.addf %10, %12 : vector<8x128xf32>
    %cst_11 = arith.constant 0.000000e+00 : f32
    %14 = vector.broadcast %cst_11 : f32 to vector<8x128xf32>
    %15 = arith.maximumf %13, %14 : vector<8x128xf32>
    %16 = arith.truncf %15 : vector<8x128xf32> to vector<8x128xbf16>
    %c0_12 = arith.constant 0 : index
    %c0_13 = arith.constant 0 : index
    %17 = vector.load %arg6[%c0_12, %c0_13] : memref<128x128xbf16, #tpu.memory_space<vmem>>, vector<128x128xbf16>
    %cst_14 = arith.constant dense<0.000000e+00> : vector<8x128xf32>
    %18 = tpu.matmul %16, %17, %cst_14 {dimension_numbers = #tpu.dot_dimension_numbers<[1], [0], [0], [1], [0, 0, 1, 1], [], []>} : vector<8x128xbf16>, vector<128x128xbf16>, vector<8x128xf32> -> vector<8x128xf32>
    %c0_15 = arith.constant 0 : index
    %c0_16 = arith.constant 0 : index
    %19 = vector.load %arg7[%c0_15, %c0_16] : memref<1x128xf32, #tpu.memory_space<vmem>>, vector<1x128xf32>
    %20 = vector.broadcast %19 : vector<1x128xf32> to vector<8x128xf32>
    %21 = arith.addf %18, %20 : vector<8x128xf32>
    %cst_17 = arith.constant 0.000000e+00 : f32
    %22 = vector.broadcast %cst_17 : f32 to vector<8x128xf32>
    %23 = arith.maximumf %21, %22 : vector<8x128xf32>
    %c0_18 = arith.constant 0 : index
    %c0_19 = arith.constant 0 : index
    %24 = vector.load %arg8[%c0_18, %c0_19] : memref<8x128xf32, #tpu.memory_space<vmem>>, vector<8x128xf32>
    tpu.vector_store %arg8[%c0_18, %c0_19], %23 {strides = array<i32>} : memref<8x128xf32, #tpu.memory_space<vmem>>, vector<8x128xf32>,
    return
  }
  func.func @transform_0(%arg0: i32) -> (i32, i32) {
    %c0_i32 = arith.constant 0 : i32
    %c0_i32_0 = arith.constant 0 : i32
    return %arg0, %c0_i32 : i32, i32
  }
  func.func @transform_1(%arg0: i32) -> (i32, i32) {
    %c0_i32 = arith.constant 0 : i32
    %c0_i32_0 = arith.constant 0 : i32
    %c0_i32_1 = arith.constant 0 : i32
    return %c0_i32, %c0_i32_0 : i32, i32
  }
  func.func @transform_2(%arg0: i32) -> (i32, i32) {
    %c0_i32 = arith.constant 0 : i32
    %c0_i32_0 = arith.constant 0 : i32
    %c0_i32_1 = arith.constant 0 : i32
    return %c0_i32, %c0_i32_0 : i32, i32
  }
  func.func @transform_3(%arg0: i32) -> (i32, i32) {
    %c0_i32 = arith.constant 0 : i32
    %c0_i32_0 = arith.constant 0 : i32
    %c0_i32_1 = arith.constant 0 : i32
    return %c0_i32, %c0_i32_0 : i32, i32
  }
  func.func @transform_4(%arg0: i32) -> (i32, i32) {
    %c0_i32 = arith.constant 0 : i32
    %c0_i32_0 = arith.constant 0 : i32
    %c0_i32_1 = arith.constant 0 : i32
    return %c0_i32, %c0_i32_0 : i32, i32
  }
  func.func @transform_5(%arg0: i32) -> (i32, i32) {
    %c0_i32 = arith.constant 0 : i32
    %c0_i32_0 = arith.constant 0 : i32
    %c0_i32_1 = arith.constant 0 : i32
    return %c0_i32, %c0_i32_0 : i32, i32
  }
  func.func @transform_6(%arg0: i32) -> (i32, i32) {
    %c0_i32 = arith.constant 0 : i32
    %c0_i32_0 = arith.constant 0 : i32
    %c0_i32_1 = arith.constant 0 : i32
    return %c0_i32, %c0_i32_0 : i32, i32
  }
  func.func @transform_7(%arg0: i32) -> (i32, i32) {
    %c0_i32 = arith.constant 0 : i32
    %c0_i32_0 = arith.constant 0 : i32
    return %arg0, %c0_i32 : i32, i32
  }
}

</mosaic_0001>

<bundles_post_ra>
// kernel: tpu_custom_call.1
= control target key start
LH: loop header
LB: loop body
LE: loop exit
PB: predicated region body
PF: predicated region fallthrough
CT: control target
= control target key end

     0   :  { %s1488_s0 = inlined_call_operand.hbm [shape: bf16[24,128], index: 0, kind: input, shape index: {}]   ;;  %s1489_s1 = inlined_call_operand.hbm [shape: bf16[128,128], index: 1, kind: input, shape index: {}]   ;;  %s1490_s2 = inlined_call_operand.vmem [shape: f32[1,128], index: 2, kind: input, shape index: {}]   ;;  %s1491_s3 = inlined_call_operand.hbm [shape: bf16[128,128], index: 3, kind: input, shape index: {}]   ;;  %s1492_s4 = inlined_call_operand.vmem [shape: f32[1,128], index: 4, kind: input, shape index: {}]   ;;  %s1493_s5 = inlined_call_operand.hbm [shape: bf16[128,128], index: 5, kind: input, shape index: {}]   ;;  %s1494_s6 = inlined_call_operand.vmem [shape: f32[1,128], index: 6, kind: input, shape index: {}]   ;;  %s1495_s7 = inlined_call_operand.hbm [shape: f32[24,128], index: 7, kind: output, shape index: {}]  }
   0x1   :  { %1500 = sst [smem:[#allocation15_spill]] %s1489_s1 }
   0x2   :  { %1501 = sst [smem:[#allocation16_spill]] %s1491_s3 }
   0x3   :  { %12 = vsyncpa [#allocation3], 0 }
   0x4   :  { %14 = vsyncpa [#allocation3 + $0x1], 0 }
   0x5   :  { %15 = vsyncpa [#allocation6], 0 }
   0x6   :  { %16 = vsyncpa [#allocation9], 0 }
   0x7   :  { %17 = vsyncpa [#allocation4], 0 }
   0x8   :  { %19 = vsyncpa [#allocation4 + $0x1], 0  ;;  %s1258_s24 = smov 0   ;;  %s1260_s25 = smov 0  }
   0x9   :  { %s1262_s26 = smov 0   ;;  %s1264_s27 = smov 0  }
   0xa LB: > { %s1279_s28 = sadd.s32 4294967295, %s1207_s27   ;;  %s792_s29 = sadd.s32 4294967294, %s1207_s27   ;;  %s1207_s27 = sphi %s1264_s27, %s1522_s27   ;;  %s1203_s26 = sphi %s1262_s26, %s1521_s26   ;;  %s1199_s25 = sphi %s1260_s25, %s1520_s25   ;;  %s1195_s24 = sphi %s1258_s24, %s1519_s24  }
   0xb   : > { %p45_p0 = scmp.ne.s32.totalorder %s1199_s25, %s1195_s24  ;;  %p1496_p1 = scmp.eq.s32.totalorder %s1279_s28, 0 }
   0xc   : > { %p201_p3 = scmp.eq.s32.totalorder %s792_s29, 2  ;;  %p793_p5 = scmp.ge.s32.totalorder %s1207_s27, 1 }
   0xd   : > { %p1288_p4 = por %p1496_p1, %p45_p0  ;;  %p208_p7 = scmp.lt.s32.totalorder %s1207_s27, 4 }
   0xe   : > { %p1293_p6 = por %p201_p3, %p45_p0  ;;  %s1209_s10 = smov [#allocation5]  }
   0xf   : > { %s1502_s30 = scalar_select %p1288_p4, 1, 0 }
  0x10   : > { %s1503_s8 = scalar_select %p1293_p6, 1, 0 }
  0x11   : > { %p1298_p8 = pnand %p793_p5, %p208_p7  ;;  %s220_s11 = sshll.u32 %s1209_s10, 4  ;;  %s221_s11 = int_to_ptr.vmem [resolvable:$true] %s220_s11 }
  0x12   : > { %s1210_s13 = smov [#allocation7]   ;;  %s1211_s15 = smov [#allocation8]  }
  0x13   : > { %s1504_s9 = scalar_select %p1298_p8, 1, 0 }
  0x14   : > { %p940_p9 = pneg %p1298_p8  ;;  %s236_s14 = sshll.u32 %s1210_s13, 4  ;;  %s237_s14 = int_to_ptr.vmem [resolvable:$true] %s236_s14 }
  0x15   : > { %s252_s16 = sshll.u32 %s1211_s15, 4  ;;  %s1040_s17 = scalar_lea.vmem %s221_s11, 1024  ;;  %s253_s16 = int_to_ptr.vmem [resolvable:$true] %s252_s16 }
  0x16   : > { %p1306_p10 = pnand %p940_p9, %p1496_p1  ;;  %p1041_p12 = scmp.ne.s32.totalorder %s221_s11, %s1040_s17 }
  0x17   : > { %p1048_p3 = scmp.lt.s32.totalorder %s221_s11, %s221_s11  ;;  %p1049_p5 = scmp.lt.s32.totalorder %s1040_s17, %s1040_s17 }
  0x18   : > { %p1031_p11 = pneg %p1306_p10 }
  0x19   : > { %p1050_p7 = por %p1049_p5, %p1048_p3 }
  0x1a   : > { %p1043_p13 = pnand %p1041_p12, %p1031_p11 }
  0x1c   : > { %p1044_p0 = pneg %p1043_p13 }
  0x1e   : > { %p1051_p9 = pnand %p1050_p7, %p1044_p0 }
  0x20   : > { %1054 = shalt.err (!%p1051_p9)
}
  0x21   : > { %s1212_s18 = smov 64   ;;  %s1213_s19 = smov 4  }
  0x22   : > { %s1506_s1 = sld [smem:[#allocation15_spill]]  ;;  %s1066_s22 = scalar_lea.vmem %s237_s14, 1024 }
  0x23   : > { %p1067_p1 = scmp.ne.s32.totalorder %s237_s14, %s1066_s22  ;;  %p1074_p2 = scmp.lt.s32.totalorder %s237_s14, %s237_s14 }
  0x24   : > { %p1075_p6 = scmp.lt.s32.totalorder %s1066_s22, %s1066_s22 }
  0x25   : > { %p1069_p12 = pnand %p1067_p1, %p1031_p11 }
  0x26   : > { %p1076_p3 = por %p1075_p6, %p1074_p2 }
  0x27   : > { %p1070_p13 = pneg %p1069_p12 }
  0x28   : > { %943 = dma.hbm_to_vmem [thread:$0]  (!%p1306_p10), %s1506_s1, 1024, %s221_s11, [#allocation6], %s1212_s18, %s1212_s18, %s1213_s19  }
  0x29   : > { %p1077_p0 = pnand %p1076_p3, %p1070_p13 }
  0x2b   : > { %1080 = shalt.err (!%p1077_p0)
}
  0x2c   : > { %s1507_s3 = sld [smem:[#allocation16_spill]]  ;;  %s1092_s10 = scalar_lea.vmem %s253_s16, 1024 }
  0x2d   : > { %p1093_p5 = scmp.ne.s32.totalorder %s253_s16, %s1092_s10  ;;  %p1100_p9 = scmp.lt.s32.totalorder %s253_s16, %s253_s16 }
  0x2e   : > { %p1101_p12 = scmp.lt.s32.totalorder %s1092_s10, %s1092_s10 }
  0x2f   : > { %p1095_p7 = pnand %p1093_p5, %p1031_p11 }
  0x30   : > { %p1102_p4 = por %p1101_p12, %p1100_p9 }
  0x31   : > { %p1096_p1 = pneg %p1095_p7 }
  0x32   : > { %946 = dma.hbm_to_vmem [thread:$0]  (!%p1306_p10), %s1507_s3, 1024, %s237_s14, [#allocation6], %s1212_s18, %s1212_s18, %s1213_s19  }
  0x33   : > { %p1103_p2 = pnand %p1102_p4, %p1096_p1 }
  0x35   : > { %1106 = shalt.err (!%p1103_p2)
}
  0x36   : > { %949 = dma.hbm_to_vmem [thread:$0]  (!%p1306_p10), %s1493_s5, 1024, %s253_s16, [#allocation9], %s1212_s18, %s1212_s18, %s1213_s19  }
  0x37   : > { %s1337_s14 = sadd.s32 1, %s1207_s27   ;;  %s32_s12 = sadd.s32 1, %s1203_s26 }
  0x38   : > { %s29_s15 = ssub.s32 %s1207_s27, %s1337_s14  ;;  %p39_p6 = scmp.ne.s32.totalorder %s1203_s26, %s1199_s25 }
  0x39   : > { %p30_p4 = scmp.eq.s32.totalorder %s29_s15, 0  ;;  %p40_p11 = scmp.eq.s32.totalorder %s1207_s27, 0 }
  0x3a   : > { %p961_p13 = scmp.lt.s32.totalorder %s1207_s27, 3  ;;  %p1508_p0 = scmp.eq.s32.totalorder %s1279_s28, 2 }
  0x3b   : > { %s1347_s17 = scalar_select %p30_p4, %s1203_s26, %s32_s12  }
  0x3c   : > { %p41_p3 = por %p40_p11, %p39_p6  ;;  %p1351_p5 = por %p1508_p0, %p39_p6 }
  0x3d   : > { %s269_s21 = sand.u32 1, %s1203_s26   ;;  %s799_s22 = sshll.u32 %s1207_s27, 6 }
  0x3e   : > { %s1509_s20 = scalar_select %p1351_p5, 1, 0 }
  0x3f   : > { %s798_s16 = sshll.u32 %s269_s21, 2  ;;  %s1360_s23 = scalar_lea.hbm %s1488_s0, %s799_s22 }
  0x40   : > { %s273_s29 = scalar_lea.vmem [#allocation2], %s798_s16  ;;  %p1362_p10 = pnand %p961_p13, %p41_p3 }
  0x41   : > { %s280_s10 = sshll.u32 %s273_s29, 4  ;;  %s270_s13 = scalar_lea.sflag [#allocation3], %s269_s21  ;;  %s281_s10 = int_to_ptr.vmem [resolvable:$true] %s280_s10 }
  0x42   : > { %s1107_s15 = scalar_lea.hbm %s1360_s23, 64  ;;  %p1109_p1 = pneg %p1362_p10 }
  0x43   : > { %p1108_p7 = scmp.ne.s32.totalorder %s1360_s23, %s1107_s15  ;;  %s1112_s18 = scalar_lea.hbm %s1488_s0, 192 }
  0x44   : > { %p1113_p2 = scmp.lt.s32.totalorder %s1360_s23, %s1488_s0  ;;  %p1114_p4 = scmp.lt.s32.totalorder %s1112_s18, %s1107_s15 }
  0x45   : > { %p1110_p9 = pnand %p1109_p1, %p1108_p7 }
  0x46   : > { %p1115_p6 = por %p1114_p4, %p1113_p2 }
  0x47   : > { %p1111_p12 = pneg %p1110_p9 }
  0x49   : > { %p1116_p11 = pnand %p1115_p6, %p1111_p12 }
  0x4b   : > { %1119 = shalt.err (!%p1116_p11)
}
  0x4c   : > { %s1120_s29 = scalar_lea.vmem %s281_s10, 64  ;;  %s1214_s21 = smov [#allocation2]  }
  0x4d   : > { %p1121_p13 = scmp.ne.s32.totalorder %s281_s10, %s1120_s29  ;;  %s1125_s1 = sshll.u32 %s1214_s21, 4  ;;  %s1126_s1 = int_to_ptr.vmem [resolvable:$false] %s1125_s1 }
  0x4e   : > { %s1127_s3 = scalar_lea.vmem %s1126_s1, 128  ;;  %p1128_p7 = scmp.lt.s32.totalorder %s281_s10, %s1126_s1 }
  0x4f   : > { %p1123_p3 = pnand %p1121_p13, %p1109_p1  ;;  %p1129_p9 = scmp.lt.s32.totalorder %s1127_s3, %s1120_s29 }
  0x51   : > { %p1124_p0 = pneg %p1123_p3  ;;  %p1130_p5 = por %p1129_p9, %p1128_p7 }
  0x53   : > { %p1131_p8 = pnand %p1130_p5, %p1124_p0 }
  0x55   : > { %1134 = shalt.err (!%p1131_p8)
}
  0x56   : > { %953 = dma.hbm_to_vmem [thread:$0]  (!%p1362_p10), %s1360_s23, 64, %s281_s10, %s270_s13  }
  0x57   : > { %p1511_p12 = scmp.ne.s32.totalorder %s1504_s9, 0 }
  0x58   : > { %s1383_s15 = sand.u32 (!%p1511_p12), 1, %s1199_s25   ;;  %p1512_p1 = scmp.ne.s32.totalorder (!%p1511_p12), %s1502_s30, 0 }
  0x59   : > { %289 = sbr.rel (%p1511_p12) target bundleno = 745 (0x2e9), region = 48  ;;  %s801_s12 = sshll.u32 (!%p1511_p12), %s1383_s15, 2 }
  0x5a   : > { %s292_s22 = scalar_lea.sflag (!%p1511_p12), [#allocation3], %s1383_s15  ;;  %s1387_s1 = scalar_lea.vmem (!%p1511_p12), [#allocation2], %s801_s12 }
  0x5e   : > { %1178 = dma.done.wait (%p1512_p1), %s292_s22, 64  }
  0x5f   : > { %1180 = vsyncadd (%p1512_p1), %s292_s22, 4294967232  ;;  %p1513_p8 = scmp.eq.s32.totalorder %s1279_s28, 0 }
  0x61   : > { %1182 = dma.done.wait (%p1513_p8), [#allocation6], 2048   ;;  %p1514_p5 = pmov %p1513_p8 }
  0x63   : > { %1184 = vsyncadd (%p1514_p5), [#allocation6], 4294965248  ;;  %p1515_p10 = pmov %p1514_p5 }
  0x64   : > { %p1516_p2 = pmov %p1514_p5 }
  0x65   : > { %1186 = dma.done.wait (%p1515_p10), [#allocation9], 1024  }
  0x66   : > { %1188 = vsyncadd (%p1516_p2), [#allocation9], 4294966272  ;;  %v1215_v0 = vmov 0.0   ;;  %vm1216_vm0 = vmmov 0   ;;  %v1005_v1 = vld [vmem:[#allocation5 + $0x38] sm:$0xff]   ;;  %v1006_v2 = vld [vmem:[#allocation5 + $0x30] sm:$0xff]  }
  0x67   : > { %864 = vmatprep.subr.bf16.mxu0 %v1215_v0  ;;  %880 = vmatprep.mubr.msk.bf16.mxu0 %vm1216_vm0, %v1215_v0  ;;  %v1007_v3 = vld [vmem:[#allocation5 + $0x28] sm:$0xff]   ;;  %v1013_v4 = vld [vmem:[#allocation7 + $0x38] sm:$0xff]   ;;  %v1008_v5 = vld [vmem:[#allocation5 + $0x20] sm:$0xff]   ;;  %s805_s10 = sshll.u32 %s1383_s15, 3  ;;  %s834_s18 = sshll.u32 %s1279_s28, 7 }
  0x68   : > { %884 = vmatprep.subr.bf16.mxu1 %v1215_v0  ;;  %900 = vmatprep.mubr.msk.bf16.mxu1 %vm1216_vm0, %v1215_v0  ;;  %v1014_v6 = vld [vmem:[#allocation7 + $0x30] sm:$0xff]   ;;  %v1009_v7 = vld [vmem:[#allocation5 + $0x18] sm:$0xff]   ;;  %v1015_v8 = vld [vmem:[#allocation7 + $0x28] sm:$0xff]   ;;  %s337_s19 = scalar_lea.vmem [#allocation10], %s805_s10  ;;  %s1446_s12 = scalar_lea.hbm %s1495_s7, %s834_s18 }
  0x69   : > { %865 = vmatpush3.bf16.msra.mxu0 %v1005_v1  ;;  %885 = vmatpush3.bf16.msra.mxu1 %v1013_v4  ;;  %v1010_v9 = vld [vmem:[#allocation5 + $0x10] sm:$0xff]   ;;  %v1016_v10 = vld [vmem:[#allocation7 + $0x20] sm:$0xff]   ;;  %v1011_v11 = vld [vmem:[#allocation5 + $0x8] sm:$0xff]   ;;  %s693_s16 = sshll.u32 %s337_s19, 4  ;;  %s680_s22 = scalar_lea.sflag [#allocation4], %s1383_s15  ;;  %s1448_s16 = int_to_ptr.vmem [resolvable:$true] %s693_s16 }
  0x6a   : > { %866 = vmatprep.subr.bf16.mxu0 %v1215_v0  ;;  %886 = vmatprep.subr.bf16.mxu1 %v1215_v0  ;;  %v1017_v12 = vld [vmem:[#allocation7 + $0x18] sm:$0xff]   ;;  %v1012_v13 = vld [vmem:[#allocation5] sm:$0xff]   ;;  %v1018_v14 = vld [vmem:[#allocation7 + $0x10] sm:$0xff]   ;;  %s1135_s28 = scalar_lea.vmem %s1448_s16, 128  ;;  %p1517_p6 = scmp.ne.s32.totalorder %s1509_s20, 0 }
  0x6b   : > { %v339_v15 = vld [vmem:[%s1387_s1] sm:$0xf]  ;;  %v1019_v16 = vld [vmem:[#allocation7 + $0x8] sm:$0xff]   ;;  %v1020_v17 = vld [vmem:[#allocation7] sm:$0xff]   ;;  %p1136_p4 = scmp.ne.s32.totalorder %s1448_s16, %s1135_s28  ;;  %s1217_s1 = smov [#allocation10]  }
  0x6c   : > { %v1021_v18 = vld [vmem:[#allocation8 + $0x38] sm:$0xff]   ;;  %v1022_v19 = vld [vmem:[#allocation8 + $0x30] sm:$0xff]   ;;  %v1023_v20 = vld [vmem:[#allocation8 + $0x28] sm:$0xff]   ;;  %s1139_s3 = sshll.u32 %s1217_s1, 4  ;;  %s1140_s3 = int_to_ptr.vmem [resolvable:$false] %s1139_s3 }
  0x6d   : > { %867 = vmatpush3.bf16.msra.mxu0 %v1006_v2  ;;  %887 = vmatpush3.bf16.msra.mxu1 %v1014_v6  ;;  %v1024_v21 = vld [vmem:[#allocation8 + $0x20] sm:$0xff]   ;;  %v1025_v22 = vld [vmem:[#allocation8 + $0x18] sm:$0xff]   ;;  %v1026_v23 = vld [vmem:[#allocation8 + $0x10] sm:$0xff]   ;;  %p1137_p11 = pnand %p1136_p4, %p1517_p6  ;;  %s1141_s30 = scalar_lea.vmem %s1140_s3, 256 }
  0x6e   : > { %868 = vmatprep.subr.bf16.mxu0 %v1215_v0  ;;  %888 = vmatprep.subr.bf16.mxu1 %v1215_v0  ;;  %v806_v24 = vld [vmem:[%s1490_s2] ss:$0 sm:$0xff]  ;;  %v1027_v32 = vld [vmem:[#allocation8 + $0x8] sm:$0xff]   ;;  %v1028_v33 = vld [vmem:[#allocation8] sm:$0xff]   ;;  %p1142_p3 = scmp.lt.s32.totalorder %s1448_s16, %s1140_s3  ;;  %p1143_p0 = scmp.lt.s32.totalorder %s1141_s30, %s1135_s28 }
  0x6f   : > { %v815_v34 = vld [vmem:[%s1492_s4] ss:$0 sm:$0xff]  ;;  %p1138_p13 = pneg %p1137_p11 }
  0x70   : > { %v824_v42 = vld [vmem:[%s1494_s6] ss:$0 sm:$0xff]  ;;  %p1144_p7 = por %p1143_p0, %p1142_p3 }
  0x71   : > { %869 = vmatpush3.bf16.msra.mxu0 %v1007_v3  ;;  %889 = vmatpush3.bf16.msra.mxu1 %v1015_v8 }
  0x72   : > { %870 = vmatprep.subr.bf16.mxu0 %v1215_v0  ;;  %890 = vmatprep.subr.bf16.mxu1 %v1215_v0  ;;  %p1145_p9 = pnand %p1144_p7, %p1138_p13 }
  0x75   : > { %871 = vmatpush3.bf16.msra.mxu0 %v1008_v5  ;;  %891 = vmatpush3.bf16.msra.mxu1 %v1016_v10 }
  0x76   : > { %872 = vmatprep.subr.bf16.mxu0 %v1215_v0  ;;  %892 = vmatprep.subr.bf16.mxu1 %v1215_v0 }
  0x79   : > { %873 = vmatpush3.bf16.msra.mxu0 %v1009_v7  ;;  %893 = vmatpush3.bf16.msra.mxu1 %v1017_v12 }
  0x7a   : > { %874 = vmatprep.subr.bf16.mxu0 %v1215_v0  ;;  %894 = vmatprep.subr.bf16.mxu1 %v1215_v0 }
  0x7d   : > { %875 = vmatpush3.bf16.msra.mxu0 %v1010_v9  ;;  %895 = vmatpush3.bf16.msra.mxu1 %v1018_v14 }
  0x7e   : > { %876 = vmatprep.subr.bf16.mxu0 %v1215_v0  ;;  %896 = vmatprep.subr.bf16.mxu1 %v1215_v0 }
  0x81   : > { %877 = vmatpush3.bf16.msra.mxu0 %v1011_v11  ;;  %897 = vmatpush3.bf16.msra.mxu1 %v1019_v16 }
  0x82   : > { %878 = vmatprep.subr.bf16.mxu0 %v1215_v0  ;;  %898 = vmatprep.subr.bf16.mxu1 %v1215_v0 }
  0x85   : > { %879 = vmatpush3.bf16.msra.mxu0 %v1012_v13  ;;  %899 = vmatpush3.bf16.msra.mxu1 %v1020_v17 }
  0x86   : > { %904 = vmatprep.subr.bf16.mxu0 %v1215_v0 }
  0x88   : > { %881 = vmatmul.mubr.bf16.vlgmr.msra.gmra.mxu0 %v339_v15 }
  0x89   : > { %920 = vmatprep.mubr.msk.bf16.mxu0 %vm1216_vm0, %v1215_v0  ;;  %905 = vmatpush3.bf16.msra.mxu0 %v1021_v18 }
  0x8a   : > { %906 = vmatprep.subr.bf16.mxu0 %v1215_v0 }
  0x8d   : > { %907 = vmatpush3.bf16.msra.mxu0 %v1022_v19 }
  0x8e   : > { %908 = vmatprep.subr.bf16.mxu0 %v1215_v0 }
  0x91   : > { %909 = vmatpush3.bf16.msra.mxu0 %v1023_v20 }
  0x92   : > { %910 = vmatprep.subr.bf16.mxu0 %v1215_v0 }
  0x95   : > { %911 = vmatpush3.bf16.msra.mxu0 %v1024_v21 }
  0x96   : > { %912 = vmatprep.subr.bf16.mxu0 %v1215_v0 }
  0x99   : > { %913 = vmatpush3.bf16.msra.mxu0 %v1025_v22 }
  0x9a   : > { %914 = vmatprep.subr.bf16.mxu0 %v1215_v0 }
  0x9d   : > { %915 = vmatpush3.bf16.msra.mxu0 %v1026_v23 }
  0x9e   : > { %916 = vmatprep.subr.bf16.mxu0 %v1215_v0 }
  0xa1   : > { %917 = vmatpush3.bf16.msra.mxu0 %v1027_v32 }
  0xa2   : > { %918 = vmatprep.subr.bf16.mxu0 %v1215_v0 }
  0xa5   : > { %919 = vmatpush3.bf16.msra.mxu0 %v1028_v33 }
 0x148   : > { %v445_v25 = vpop.f32.mrf.mxu0 }
 0x149   : > { %v446_v26 = vadd.f32 %v806_v24, %v445_v25 }
 0x14a   : > { %v882_v27 = vpop.f32.mrf.mxu0 }
 0x14b   : > { %v451_v28 = vmax.f32 %v446_v26, 0.0 }
 0x14c   : > { %v448_v29 = vpop.f32.mrf.mxu0 }
 0x14d   : > { %v452_v30 = vpack.c.bf16 %v451_v28, %v451_v28 }
 0x14e   : > { %v883_v31 = vpop.f32.mrf.mxu0 }
 0x14f   : > { %901 = vmatmul.mubr.bf16.vlgmr.msra.gmra.mxu1 %v452_v30 }
 0x20f   : > { %v558_v35 = vpop.f32.mrf.mxu1 }
 0x210   : > { %v559_v36 = vadd.f32 %v815_v34, %v558_v35 }
 0x211   : > { %v902_v37 = vpop.f32.mrf.mxu1 }
 0x212   : > { %v564_v38 = vmax.f32 %v559_v36, 0.0 }
 0x213   : > { %v561_v39 = vpop.f32.mrf.mxu1 }
 0x214   : > { %v565_v40 = vpack.c.bf16 %v564_v38, %v564_v38 }
 0x215   : > { %v903_v41 = vpop.f32.mrf.mxu1 }
 0x216   : > { %921 = vmatmul.mubr.bf16.vlgmr.msra.gmra.mxu0 %v565_v40 }
 0x2d6   : > { %v671_v43 = vpop.f32.mrf.mxu0 }
 0x2d7   : > { %v672_v44 = vadd.f32 %v824_v42, %v671_v43 }
 0x2d8   : > { %v922_v45 = vpop.f32.mrf.mxu0 }
 0x2d9   : > { %v677_v46 = vmax.f32 %v672_v44, 0.0 }
 0x2da   : > { %v674_v47 = vpop.f32.mrf.mxu0 }
 0x2db   : > { %678 = vst [vmem:[%s337_s19] sm:$0xff] %v677_v46 }
 0x2dc   : > { %v923_v48 = vpop.f32.mrf.mxu0 }
 0x2dd   : > { %1148 = shalt.err (!%p1145_p9)
}
 0x2de   : > { %s1149_s9 = scalar_lea.hbm %s1446_s12, 128  ;;  %s1153_s10 = scalar_lea.hbm %s1495_s7, 384 }
 0x2df   : > { %p1150_p12 = scmp.ne.s32.totalorder %s1446_s12, %s1149_s9  ;;  %p1154_p5 = scmp.lt.s32.totalorder %s1446_s12, %s1495_s7 }
 0x2e0   : > { %p1155_p10 = scmp.lt.s32.totalorder %s1153_s10, %s1149_s9 }
 0x2e1   : > { %p1151_p1 = pnand %p1150_p12, %p1517_p6 }
 0x2e2   : > { %p1156_p2 = por %p1155_p10, %p1154_p5 }
 0x2e3   : > { %p1152_p8 = pneg %p1151_p1 }
 0x2e5   : > { %p1157_p4 = pnand %p1156_p2, %p1152_p8 }
 0x2e7   : > { %1160 = shalt.err (!%p1157_p4)
}
 0x2e8   : > { %938 = dma.vmem_to_hbm [thread:$0]  (%p1517_p6), %s1448_s16, 128, %s1446_s12, %s680_s22  }
 0x2e9 PF: > { %p965_p11 = scmp.ge.s32.totalorder %s1207_s27, 2  ;;  %s705_s18 = sand.u32 1, %s1195_s24  }
 0x2ea   : > { %p1518_p13 = scmp.ne.s32.totalorder %s1503_s8, 0  ;;  %s706_s19 = scalar_lea.sflag [#allocation4], %s705_s18 }
 0x2ec   : > { %p955_p3 = pnand %p965_p11, %p1518_p13 }
 0x2ee   : > { %p956_p0 = pneg %p955_p3 }
 0x2f0   : > { %1190 = dma.done.wait (%p956_p0), %s706_s19, 128  }
 0x2f1   : > { %1192 = vsyncadd (%p956_p0), %s706_s19, 4294967168  ;;  %p22_p7 = scmp.ge.s32.totalorder %s1337_s14, 5   ;;  %s1519_s24 = smov %s1199_s25 }
 0x2f2   : > { %s1520_s25 = smov %s1203_s26  ;;  %s1521_s26 = smov %s1347_s17 }
 0x2f3   : > { %s1522_s27 = smov %s1337_s14  ;;  %24 = sbr.rel (!%p22_p7) target bundleno = 10 (0xa), region = 105 }
 0x2f8   :  { %711 = vsyncpa [#allocation3], 1 }
 0x2f9   :  { %713 = vsyncpa [#allocation3 + $0x1], 1 }
 0x2fa   :  { %714 = vsyncpa [#allocation6], 1 }
 0x2fb   :  { %715 = vsyncpa [#allocation9], 1 }
 0x2fc   :  { %716 = vsyncpa [#allocation4], 1 }
 0x2fd   :  { %718 = vsyncpa [#allocation4 + $0x1], 1 }

// kernel: tpu_custom_call.1
= control target key start
LH: loop header
LB: loop body
LE: loop exit
PB: predicated region body
PF: predicated region fallthrough
CT: control target
= control target key end

     0   :  { %s1488_s0 = inlined_call_operand.hbm [shape: bf16[24,128], index: 0, kind: input, shape index: {}]   ;;  %s1489_s1 = inlined_call_operand.hbm [shape: bf16[128,128], index: 1, kind: input, shape index: {}]   ;;  %s1490_s2 = inlined_call_operand.vmem [shape: f32[1,128], index: 2, kind: input, shape index: {}]   ;;  %s1491_s3 = inlined_call_operand.hbm [shape: bf16[128,128], index: 3, kind: input, shape index: {}]   ;;  %s1492_s4 = inlined_call_operand.vmem [shape: f32[1,128], index: 4, kind: input, shape index: {}]   ;;  %s1493_s5 = inlined_call_operand.hbm [shape: bf16[128,128], index: 5, kind: input, shape index: {}]   ;;  %s1494_s6 = inlined_call_operand.vmem [shape: f32[1,128], index: 6, kind: input, shape index: {}]   ;;  %s1495_s7 = inlined_call_operand.hbm [shape: f32[24,128], index: 7, kind: output, shape index: {}]  }
   0x1   :  { %1500 = sst [smem:[#allocation15_spill]] %s1489_s1 }
   0x2   :  { %1501 = sst [smem:[#allocation16_spill]] %s1491_s3 }
   0x3   :  { %12 = vsyncpa [#allocation3], 0 }
   0x4   :  { %14 = vsyncpa [#allocation3 + $0x1], 0 }
   0x5   :  { %15 = vsyncpa [#allocation6], 0 }
   0x6   :  { %16 = vsyncpa [#allocation9], 0 }
   0x7   :  { %17 = vsyncpa [#allocation4], 0 }
   0x8   :  { %19 = vsyncpa [#allocation4 + $0x1], 0  ;;  %s1258_s24 = smov 0   ;;  %s1260_s25 = smov 0  }
   0x9   :  { %s1262_s26 = smov 0   ;;  %s1264_s27 = smov 0  }
   0xa LB: > { %s1279_s28 = sadd.s32 4294967295, %s1207_s27   ;;  %s792_s29 = sadd.s32 4294967294, %s1207_s27   ;;  %s1207_s27 = sphi %s1264_s27, %s1522_s27   ;;  %s1203_s26 = sphi %s1262_s26, %s1521_s26   ;;  %s1199_s25 = sphi %s1260_s25, %s1520_s25   ;;  %s1195_s24 = sphi %s1258_s24, %s1519_s24  }
   0xb   : > { %p45_p0 = scmp.ne.s32.totalorder %s1199_s25, %s1195_s24  ;;  %p1496_p1 = scmp.eq.s32.totalorder %s1279_s28, 0 }
   0xc   : > { %p201_p3 = scmp.eq.s32.totalorder %s792_s29, 2  ;;  %p793_p5 = scmp.ge.s32.totalorder %s1207_s27, 1 }
   0xd   : > { %p1288_p4 = por %p1496_p1, %p45_p0  ;;  %p208_p7 = scmp.lt.s32.totalorder %s1207_s27, 4 }
   0xe   : > { %p1293_p6 = por %p201_p3, %p45_p0  ;;  %s1209_s10 = smov [#allocation5]  }
   0xf   : > { %s1502_s30 = scalar_select %p1288_p4, 1, 0 }
  0x10   : > { %s1503_s8 = scalar_select %p1293_p6, 1, 0 }
  0x11   : > { %p1298_p8 = pnand %p793_p5, %p208_p7  ;;  %s220_s11 = sshll.u32 %s1209_s10, 4  ;;  %s221_s11 = int_to_ptr.vmem [resolvable:$true] %s220_s11 }
  0x12   : > { %s1210_s13 = smov [#allocation7]   ;;  %s1211_s15 = smov [#allocation8]  }
  0x13   : > { %s1504_s9 = scalar_select %p1298_p8, 1, 0 }
  0x14   : > { %p940_p9 = pneg %p1298_p8  ;;  %s236_s14 = sshll.u32 %s1210_s13, 4  ;;  %s237_s14 = int_to_ptr.vmem [resolvable:$true] %s236_s14 }
  0x15   : > { %s252_s16 = sshll.u32 %s1211_s15, 4  ;;  %s1040_s17 = scalar_lea.vmem %s221_s11, 1024  ;;  %s253_s16 = int_to_ptr.vmem [resolvable:$true] %s252_s16 }
  0x16   : > { %p1306_p10 = pnand %p940_p9, %p1496_p1  ;;  %p1041_p12 = scmp.ne.s32.totalorder %s221_s11, %s1040_s17 }
  0x17   : > { %p1048_p3 = scmp.lt.s32.totalorder %s221_s11, %s221_s11  ;;  %p1049_p5 = scmp.lt.s32.totalorder %s1040_s17, %s1040_s17 }
  0x18   : > { %p1031_p11 = pneg %p1306_p10 }
  0x19   : > { %p1050_p7 = por %p1049_p5, %p1048_p3 }
  0x1a   : > { %p1043_p13 = pnand %p1041_p12, %p1031_p11 }
  0x1c   : > { %p1044_p0 = pneg %p1043_p13 }
  0x1e   : > { %p1051_p9 = pnand %p1050_p7, %p1044_p0 }
  0x20   : > { %1054 = shalt.err (!%p1051_p9)
}
  0x21   : > { %s1212_s18 = smov 64   ;;  %s1213_s19 = smov 4  }
  0x22   : > { %s1506_s1 = sld [smem:[#allocation15_spill]]  ;;  %s1066_s22 = scalar_lea.vmem %s237_s14, 1024 }
  0x23   : > { %p1067_p1 = scmp.ne.s32.totalorder %s237_s14, %s1066_s22  ;;  %p1074_p2 = scmp.lt.s32.totalorder %s237_s14, %s237_s14 }
  0x24   : > { %p1075_p6 = scmp.lt.s32.totalorder %s1066_s22, %s1066_s22 }
  0x25   : > { %p1069_p12 = pnand %p1067_p1, %p1031_p11 }
  0x26   : > { %p1076_p3 = por %p1075_p6, %p1074_p2 }
  0x27   : > { %p1070_p13 = pneg %p1069_p12 }
  0x28   : > { %943 = dma.hbm_to_vmem [thread:$0]  (!%p1306_p10), %s1506_s1, 1024, %s221_s11, [#allocation6], %s1212_s18, %s1212_s18, %s1213_s19  }
  0x29   : > { %p1077_p0 = pnand %p1076_p3, %p1070_p13 }
  0x2b   : > { %1080 = shalt.err (!%p1077_p0)
}
  0x2c   : > { %s1507_s3 = sld [smem:[#allocation16_spill]]  ;;  %s1092_s10 = scalar_lea.vmem %s253_s16, 1024 }
  0x2d   : > { %p1093_p5 = scmp.ne.s32.totalorder %s253_s16, %s1092_s10  ;;  %p1100_p9 = scmp.lt.s32.totalorder %s253_s16, %s253_s16 }
  0x2e   : > { %p1101_p12 = scmp.lt.s32.totalorder %s1092_s10, %s1092_s10 }
  0x2f   : > { %p1095_p7 = pnand %p1093_p5, %p1031_p11 }
  0x30   : > { %p1102_p4 = por %p1101_p12, %p1100_p9 }
  0x31   : > { %p1096_p1 = pneg %p1095_p7 }
  0x32   : > { %946 = dma.hbm_to_vmem [thread:$0]  (!%p1306_p10), %s1507_s3, 1024, %s237_s14, [#allocation6], %s1212_s18, %s1212_s18, %s1213_s19  }
  0x33   : > { %p1103_p2 = pnand %p1102_p4, %p1096_p1 }
  0x35   : > { %1106 = shalt.err (!%p1103_p2)
}
  0x36   : > { %949 = dma.hbm_to_vmem [thread:$0]  (!%p1306_p10), %s1493_s5, 1024, %s253_s16, [#allocation9], %s1212_s18, %s1212_s18, %s1213_s19  }
  0x37   : > { %s1337_s14 = sadd.s32 1, %s1207_s27   ;;  %s32_s12 = sadd.s32 1, %s1203_s26 }
  0x38   : > { %s29_s15 = ssub.s32 %s1207_s27, %s1337_s14  ;;  %p39_p6 = scmp.ne.s32.totalorder %s1203_s26, %s1199_s25 }
  0x39   : > { %p30_p4 = scmp.eq.s32.totalorder %s29_s15, 0  ;;  %p40_p11 = scmp.eq.s32.totalorder %s1207_s27, 0 }
  0x3a   : > { %p961_p13 = scmp.lt.s32.totalorder %s1207_s27, 3  ;;  %p1508_p0 = scmp.eq.s32.totalorder %s1279_s28, 2 }
  0x3b   : > { %s1347_s17 = scalar_select %p30_p4, %s1203_s26, %s32_s12  }
  0x3c   : > { %p41_p3 = por %p40_p11, %p39_p6  ;;  %p1351_p5 = por %p1508_p0, %p39_p6 }
  0x3d   : > { %s269_s21 = sand.u32 1, %s1203_s26   ;;  %s799_s22 = sshll.u32 %s1207_s27, 6 }
  0x3e   : > { %s1509_s20 = scalar_select %p1351_p5, 1, 0 }
  0x3f   : > { %s798_s16 = sshll.u32 %s269_s21, 2  ;;  %s1360_s23 = scalar_lea.hbm %s1488_s0, %s799_s22 }
  0x40   : > { %s273_s29 = scalar_lea.vmem [#allocation2], %s798_s16  ;;  %p1362_p10 = pnand %p961_p13, %p41_p3 }
  0x41   : > { %s280_s10 = sshll.u32 %s273_s29, 4  ;;  %s270_s13 = scalar_lea.sflag [#allocation3], %s269_s21  ;;  %s281_s10 = int_to_ptr.vmem [resolvable:$true] %s280_s10 }
  0x42   : > { %s1107_s15 = scalar_lea.hbm %s1360_s23, 64  ;;  %p1109_p1 = pneg %p1362_p10 }
  0x43   : > { %p1108_p7 = scmp.ne.s32.totalorder %s1360_s23, %s1107_s15  ;;  %s1112_s18 = scalar_lea.hbm %s1488_s0, 192 }
  0x44   : > { %p1113_p2 = scmp.lt.s32.totalorder %s1360_s23, %s1488_s0  ;;  %p1114_p4 = scmp.lt.s32.totalorder %s1112_s18, %s1107_s15 }
  0x45   : > { %p1110_p9 = pnand %p1109_p1, %p1108_p7 }
  0x46   : > { %p1115_p6 = por %p1114_p4, %p1113_p2 }
  0x47   : > { %p1111_p12 = pneg %p1110_p9 }
  0x49   : > { %p1116_p11 = pnand %p1115_p6, %p1111_p12 }
  0x4b   : > { %1119 = shalt.err (!%p1116_p11)
}
  0x4c   : > { %s1120_s29 = scalar_lea.vmem %s281_s10, 64  ;;  %s1214_s21 = smov [#allocation2]  }
  0x4d   : > { %p1121_p13 = scmp.ne.s32.totalorder %s281_s10, %s1120_s29  ;;  %s1125_s1 = sshll.u32 %s1214_s21, 4  ;;  %s1126_s1 = int_to_ptr.vmem [resolvable:$false] %s1125_s1 }
  0x4e   : > { %s1127_s3 = scalar_lea.vmem %s1126_s1, 128  ;;  %p1128_p7 = scmp.lt.s32.totalorder %s281_s10, %s1126_s1 }
  0x4f   : > { %p1123_p3 = pnand %p1121_p13, %p1109_p1  ;;  %p1129_p9 = scmp.lt.s32.totalorder %s1127_s3, %s1120_s29 }
  0x51   : > { %p1124_p0 = pneg %p1123_p3  ;;  %p1130_p5 = por %p1129_p9, %p1128_p7 }
  0x53   : > { %p1131_p8 = pnand %p1130_p5, %p1124_p0 }
  0x55   : > { %1134 = shalt.err (!%p1131_p8)
}
  0x56   : > { %953 = dma.hbm_to_vmem [thread:$0]  (!%p1362_p10), %s1360_s23, 64, %s281_s10, %s270_s13  }
  0x57   : > { %p1511_p12 = scmp.ne.s32.totalorder %s1504_s9, 0 }
  0x58   : > { %s1383_s15 = sand.u32 (!%p1511_p12), 1, %s1199_s25   ;;  %p1512_p1 = scmp.ne.s32.totalorder (!%p1511_p12), %s1502_s30, 0 }
  0x59   : > { %289 = sbr.rel (%p1511_p12) target bundleno = 745 (0x2e9), region = 48  ;;  %s801_s12 = sshll.u32 (!%p1511_p12), %s1383_s15, 2 }
  0x5a   : > { %s292_s22 = scalar_lea.sflag (!%p1511_p12), [#allocation3], %s1383_s15  ;;  %s1387_s1 = scalar_lea.vmem (!%p1511_p12), [#allocation2], %s801_s12 }
  0x5e   : > { %1178 = dma.done.wait (%p1512_p1), %s292_s22, 64  }
  0x5f   : > { %1180 = vsyncadd (%p1512_p1), %s292_s22, 4294967232  ;;  %p1513_p8 = scmp.eq.s32.totalorder %s1279_s28, 0 }
  0x61   : > { %1182 = dma.done.wait (%p1513_p8), [#allocation6], 2048   ;;  %p1514_p5 = pmov %p1513_p8 }
  0x63   : > { %1184 = vsyncadd (%p1514_p5), [#allocation6], 4294965248  ;;  %p1515_p10 = pmov %p1514_p5 }
  0x64   : > { %p1516_p2 = pmov %p1514_p5 }
  0x65   : > { %1186 = dma.done.wait (%p1515_p10), [#allocation9], 1024  }
  0x66   : > { %1188 = vsyncadd (%p1516_p2), [#allocation9], 4294966272  ;;  %v1215_v0 = vmov 0.0   ;;  %vm1216_vm0 = vmmov 0   ;;  %v1005_v1 = vld [vmem:[#allocation5 + $0x38] sm:$0xff]   ;;  %v1006_v2 = vld [vmem:[#allocation5 + $0x30] sm:$0xff]  }
  0x67   : > { %864 = vmatprep.subr.bf16.mxu0 %v1215_v0  ;;  %880 = vmatprep.mubr.msk.bf16.mxu0 %vm1216_vm0, %v1215_v0  ;;  %v1007_v3 = vld [vmem:[#allocation5 + $0x28] sm:$0xff]   ;;  %v1013_v4 = vld [vmem:[#allocation7 + $0x38] sm:$0xff]   ;;  %v1008_v5 = vld [vmem:[#allocation5 + $0x20] sm:$0xff]   ;;  %s805_s10 = sshll.u32 %s1383_s15, 3  ;;  %s834_s18 = sshll.u32 %s1279_s28, 7 }
  0x68   : > { %884 = vmatprep.subr.bf16.mxu1 %v1215_v0  ;;  %900 = vmatprep.mubr.msk.bf16.mxu1 %vm1216_vm0, %v1215_v0  ;;  %v1014_v6 = vld [vmem:[#allocation7 + $0x30] sm:$0xff]   ;;  %v1009_v7 = vld [vmem:[#allocation5 + $0x18] sm:$0xff]   ;;  %v1015_v8 = vld [vmem:[#allocation7 + $0x28] sm:$0xff]   ;;  %s337_s19 = scalar_lea.vmem [#allocation10], %s805_s10  ;;  %s1446_s12 = scalar_lea.hbm %s1495_s7, %s834_s18 }
  0x69   : > { %865 = vmatpush3.bf16.msra.mxu0 %v1005_v1  ;;  %885 = vmatpush3.bf16.msra.mxu1 %v1013_v4  ;;  %v1010_v9 = vld [vmem:[#allocation5 + $0x10] sm:$0xff]   ;;  %v1016_v10 = vld [vmem:[#allocation7 + $0x20] sm:$0xff]   ;;  %v1011_v11 = vld [vmem:[#allocation5 + $0x8] sm:$0xff]   ;;  %s693_s16 = sshll.u32 %s337_s19, 4  ;;  %s680_s22 = scalar_lea.sflag [#allocation4], %s1383_s15  ;;  %s1448_s16 = int_to_ptr.vmem [resolvable:$true] %s693_s16 }
  0x6a   : > { %866 = vmatprep.subr.bf16.mxu0 %v1215_v0  ;;  %886 = vmatprep.subr.bf16.mxu1 %v1215_v0  ;;  %v1017_v12 = vld [vmem:[#allocation7 + $0x18] sm:$0xff]   ;;  %v1012_v13 = vld [vmem:[#allocation5] sm:$0xff]   ;;  %v1018_v14 = vld [vmem:[#allocation7 + $0x10] sm:$0xff]   ;;  %s1135_s28 = scalar_lea.vmem %s1448_s16, 128  ;;  %p1517_p6 = scmp.ne.s32.totalorder %s1509_s20, 0 }
  0x6b   : > { %v339_v15 = vld [vmem:[%s1387_s1] sm:$0xf]  ;;  %v1019_v16 = vld [vmem:[#allocation7 + $0x8] sm:$0xff]   ;;  %v1020_v17 = vld [vmem:[#allocation7] sm:$0xff]   ;;  %p1136_p4 = scmp.ne.s32.totalorder %s1448_s16, %s1135_s28  ;;  %s1217_s1 = smov [#allocation10]  }
  0x6c   : > { %v1021_v18 = vld [vmem:[#allocation8 + $0x38] sm:$0xff]   ;;  %v1022_v19 = vld [vmem:[#allocation8 + $0x30] sm:$0xff]   ;;  %v1023_v20 = vld [vmem:[#allocation8 + $0x28] sm:$0xff]   ;;  %s1139_s3 = sshll.u32 %s1217_s1, 4  ;;  %s1140_s3 = int_to_ptr.vmem [resolvable:$false] %s1139_s3 }
  0x6d   : > { %867 = vmatpush3.bf16.msra.mxu0 %v1006_v2  ;;  %887 = vmatpush3.bf16.msra.mxu1 %v1014_v6  ;;  %v1024_v21 = vld [vmem:[#allocation8 + $0x20] sm:$0xff]   ;;  %v1025_v22 = vld [vmem:[#allocation8 + $0x18] sm:$0xff]   ;;  %v1026_v23 = vld [vmem:[#allocation8 + $0x10] sm:$0xff]   ;;  %p1137_p11 = pnand %p1136_p4, %p1517_p6  ;;  %s1141_s30 = scalar_lea.vmem %s1140_s3, 256 }
  0x6e   : > { %868 = vmatprep.subr.bf16.mxu0 %v1215_v0  ;;  %888 = vmatprep.subr.bf16.mxu1 %v1215_v0  ;;  %v806_v24 = vld [vmem:[%s1490_s2] ss:$0 sm:$0xff]  ;;  %v1027_v32 = vld [vmem:[#allocation8 + $0x8] sm:$0xff]   ;;  %v1028_v33 = vld [vmem:[#allocation8] sm:$0xff]   ;;  %p1142_p3 = scmp.lt.s32.totalorder %s1448_s16, %s1140_s3  ;;  %p1143_p0 = scmp.lt.s32.totalorder %s1141_s30, %s1135_s28 }
  0x6f   : > { %v815_v34 = vld [vmem:[%s1492_s4] ss:$0 sm:$0xff]  ;;  %p1138_p13 = pneg %p1137_p11 }
  0x70   : > { %v824_v42 = vld [vmem:[%s1494_s6] ss:$0 sm:$0xff]  ;;  %p1144_p7 = por %p1143_p0, %p1142_p3 }
  0x71   : > { %869 = vmatpush3.bf16.msra.mxu0 %v1007_v3  ;;  %889 = vmatpush3.bf16.msra.mxu1 %v1015_v8 }
  0x72   : > { %870 = vmatprep.subr.bf16.mxu0 %v1215_v0  ;;  %890 = vmatprep.subr.bf16.mxu1 %v1215_v0  ;;  %p1145_p9 = pnand %p1144_p7, %p1138_p13 }
  0x75   : > { %871 = vmatpush3.bf16.msra.mxu0 %v1008_v5  ;;  %891 = vmatpush3.bf16.msra.mxu1 %v1016_v10 }
  0x76   : > { %872 = vmatprep.subr.bf16.mxu0 %v1215_v0  ;;  %892 = vmatprep.subr.bf16.mxu1 %v1215_v0 }
  0x79   : > { %873 = vmatpush3.bf16.msra.mxu0 %v1009_v7  ;;  %893 = vmatpush3.bf16.msra.mxu1 %v1017_v12 }
  0x7a   : > { %874 = vmatprep.subr.bf16.mxu0 %v1215_v0  ;;  %894 = vmatprep.subr.bf16.mxu1 %v1215_v0 }
  0x7d   : > { %875 = vmatpush3.bf16.msra.mxu0 %v1010_v9  ;;  %895 = vmatpush3.bf16.msra.mxu1 %v1018_v14 }
  0x7e   : > { %876 = vmatprep.subr.bf16.mxu0 %v1215_v0  ;;  %896 = vmatprep.subr.bf16.mxu1 %v1215_v0 }
  0x81   : > { %877 = vmatpush3.bf16.msra.mxu0 %v1011_v11  ;;  %897 = vmatpush3.bf16.msra.mxu1 %v1019_v16 }
  0x82   : > { %878 = vmatprep.subr.bf16.mxu0 %v1215_v0  ;;  %898 = vmatprep.subr.bf16.mxu1 %v1215_v0 }
  0x85   : > { %879 = vmatpush3.bf16.msra.mxu0 %v1012_v13  ;;  %899 = vmatpush3.bf16.msra.mxu1 %v1020_v17 }
  0x86   : > { %904 = vmatprep.subr.bf16.mxu0 %v1215_v0 }
  0x88   : > { %881 = vmatmul.mubr.bf16.vlgmr.msra.gmra.mxu0 %v339_v15 }
  0x89   : > { %920 = vmatprep.mubr.msk.bf16.mxu0 %vm1216_vm0, %v1215_v0  ;;  %905 = vmatpush3.bf16.msra.mxu0 %v1021_v18 }
  0x8a   : > { %906 = vmatprep.subr.bf16.mxu0 %v1215_v0 }
  0x8d   : > { %907 = vmatpush3.bf16.msra.mxu0 %v1022_v19 }
  0x8e   : > { %908 = vmatprep.subr.bf16.mxu0 %v1215_v0 }
  0x91   : > { %909 = vmatpush3.bf16.msra.mxu0 %v1023_v20 }
  0x92   : > { %910 = vmatprep.subr.bf16.mxu0 %v1215_v0 }
  0x95   : > { %911 = vmatpush3.bf16.msra.mxu0 %v1024_v21 }
  0x96   : > { %912 = vmatprep.subr.bf16.mxu0 %v1215_v0 }
  0x99   : > { %913 = vmatpush3.bf16.msra.mxu0 %v1025_v22 }
  0x9a   : > { %914 = vmatprep.subr.bf16.mxu0 %v1215_v0 }
  0x9d   : > { %915 = vmatpush3.bf16.msra.mxu0 %v1026_v23 }
  0x9e   : > { %916 = vmatprep.subr.bf16.mxu0 %v1215_v0 }
  0xa1   : > { %917 = vmatpush3.bf16.msra.mxu0 %v1027_v32 }
  0xa2   : > { %918 = vmatprep.subr.bf16.mxu0 %v1215_v0 }
  0xa5   : > { %919 = vmatpush3.bf16.msra.mxu0 %v1028_v33 }
 0x148   : > { %v445_v25 = vpop.f32.mrf.mxu0 }
 0x149   : > { %v446_v26 = vadd.f32 %v806_v24, %v445_v25 }
 0x14a   : > { %v882_v27 = vpop.f32.mrf.mxu0 }
 0x14b   : > { %v451_v28 = vmax.f32 %v446_v26, 0.0 }
 0x14c   : > { %v448_v29 = vpop.f32.mrf.mxu0 }
 0x14d   : > { %v452_v30 = vpack.c.bf16 %v451_v28, %v451_v28 }
 0x14e   : > { %v883_v31 = vpop.f32.mrf.mxu0 }
 0x14f   : > { %901 = vmatmul.mubr.bf16.vlgmr.msra.gmra.mxu1 %v452_v30 }
 0x20f   : > { %v558_v35 = vpop.f32.mrf.mxu1 }
 0x210   : > { %v559_v36 = vadd.f32 %v815_v34, %v558_v35 }
 0x211   : > { %v902_v37 = vpop.f32.mrf.mxu1 }
 0x212   : > { %v564_v38 = vmax.f32 %v559_v36, 0.0 }
 0x213   : > { %v561_v39 = vpop.f32.mrf.mxu1 }
 0x214   : > { %v565_v40 = vpack.c.bf16 %v564_v38, %v564_v38 }
 0x215   : > { %v903_v41 = vpop.f32.mrf.mxu1 }
 0x216   : > { %921 = vmatmul.mubr.bf16.vlgmr.msra.gmra.mxu0 %v565_v40 }
 0x2d6   : > { %v671_v43 = vpop.f32.mrf.mxu0 }
 0x2d7   : > { %v672_v44 = vadd.f32 %v824_v42, %v671_v43 }
 0x2d8   : > { %v922_v45 = vpop.f32.mrf.mxu0 }
 0x2d9   : > { %v677_v46 = vmax.f32 %v672_v44, 0.0 }
 0x2da   : > { %v674_v47 = vpop.f32.mrf.mxu0 }
 0x2db   : > { %678 = vst [vmem:[%s337_s19] sm:$0xff] %v677_v46 }
 0x2dc   : > { %v923_v48 = vpop.f32.mrf.mxu0 }
 0x2dd   : > { %1148 = shalt.err (!%p1145_p9)
}
 0x2de   : > { %s1149_s9 = scalar_lea.hbm %s1446_s12, 128  ;;  %s1153_s10 = scalar_lea.hbm %s1495_s7, 384 }
 0x2df   : > { %p1150_p12 = scmp.ne.s32.totalorder %s1446_s12, %s1149_s9  ;;  %p1154_p5 = scmp.lt.s32.totalorder %s1446_s12, %s1495_s7 }
 0x2e0   : > { %p1155_p10 = scmp.lt.s32.totalorder %s1153_s10, %s1149_s9 }
 0x2e1   : > { %p1151_p1 = pnand %p1150_p12, %p1517_p6 }
 0x2e2   : > { %p1156_p2 = por %p1155_p10, %p1154_p5 }
 0x2e3   : > { %p1152_p8 = pneg %p1151_p1 }
 0x2e5   : > { %p1157_p4 = pnand %p1156_p2, %p1152_p8 }
 0x2e7   : > { %1160 = shalt.err (!%p1157_p4)
}
 0x2e8   : > { %938 = dma.vmem_to_hbm [thread:$0]  (%p1517_p6), %s1448_s16, 128, %s1446_s12, %s680_s22  }
 0x2e9 PF: > { %p965_p11 = scmp.ge.s32.totalorder %s1207_s27, 2  ;;  %s705_s18 = sand.u32 1, %s1195_s24  }
 0x2ea   : > { %p1518_p13 = scmp.ne.s32.totalorder %s1503_s8, 0  ;;  %s706_s19 = scalar_lea.sflag [#allocation4], %s705_s18 }
 0x2ec   : > { %p955_p3 = pnand %p965_p11, %p1518_p13 }
 0x2ee   : > { %p956_p0 = pneg %p955_p3 }
 0x2f0   : > { %1190 = dma.done.wait (%p956_p0), %s706_s19, 128  }
 0x2f1   : > { %1192 = vsyncadd (%p956_p0), %s706_s19, 4294967168  ;;  %p22_p7 = scmp.ge.s32.totalorder %s1337_s14, 5   ;;  %s1519_s24 = smov %s1199_s25 }
 0x2f2   : > { %s1520_s25 = smov %s1203_s26  ;;  %s1521_s26 = smov %s1347_s17 }
 0x2f3   : > { %s1522_s27 = smov %s1337_s14  ;;  %24 = sbr.rel (!%p22_p7) target bundleno = 10 (0xa), region = 105 }
 0x2f8   :  { %711 = vsyncpa [#allocation3], 1 }
 0x2f9   :  { %713 = vsyncpa [#allocation3 + $0x1], 1 }
 0x2fa   :  { %714 = vsyncpa [#allocation6], 1 }
 0x2fb   :  { %715 = vsyncpa [#allocation9], 1 }
 0x2fc   :  { %716 = vsyncpa [#allocation4], 1 }
 0x2fd   :  { %718 = vsyncpa [#allocation4 + $0x1], 1 }

</bundles_post_ra>
